<compile_context>
chip_gen: v6e
topology: v6e:2x2x1
jax: 0.10.0
libtpu: 0.0.40
codegen_flags: <defaults>
</compile_context>

<pallas_src>
import jax
import jax.numpy as jnp
from jax import lax
from jax.experimental import pallas as pl
from jax.experimental.pallas import tpu as pltpu

LANE = 128


def _round_up(n, m=LANE):
    return ((n + m - 1) // m) * m


def _pad2(x, rows, cols):
    r, c = x.shape
    return jnp.pad(x, ((0, rows - r), (0, cols - c)))


def _pick_tile(n, candidates):
    for c in candidates:
        if n >= c and n % c == 0:
            return c
    return n  # small / ragged sizes: use the full dimension as one block


def _simclr_classifier_kernel(h_ref, m_ref,
                              w1_ref, b1_ref,
                              w2_ref, b2_ref,
                              w3_ref, b3_ref,
                              o_ref,
                              sum_acc, cnt_acc):
    s = pl.program_id(1)

    @pl.when(s == 0)
    def _():
        sum_acc[...] = jnp.zeros_like(sum_acc)
        cnt_acc[...] = jnp.zeros_like(cnt_acc)

    m = m_ref[...]                                   # [TB, TS]    bf16 (0/1)
    h = h_ref[...]                                   # [TB, TS, D] bf16
    # Masked partial sum over this sequence chunk as an MXU contraction
    # ([TB,1,TS] x [TB,TS,D] -> [TB,1,D]) — no [TB,TS,D] f32 temporary, no
    # cross-sublane VPU/XLU reduction.
    part = jnp.einsum("bqs,bsd->bqd", m[:, None, :], h,
                      preferred_element_type=jnp.float32)
    sum_acc[...] += part[:, 0, :]
    cnt_acc[...] += jnp.sum(m.astype(jnp.float32), axis=-1, keepdims=True)

    @pl.when(s == pl.num_programs(1) - 1)
    def _():
        # Masked mean pool (counts clamped at 1e-9) — reciprocal on the EUP.
        inv_cnt = pl.reciprocal(jnp.maximum(cnt_acc[...], 1e-9), approx=True)
        pooled = sum_acc[...] * inv_cnt                         # [TB, D]
        # F.normalize(pooled, dim=-1): clamp_min(1e-12) on the norm is
        # equivalent to clamping the squared norm at 1e-24, then rsqrt (EUP).
        sumsq = jnp.sum(pooled * pooled, axis=-1, keepdims=True)
        q = pooled * lax.rsqrt(jnp.maximum(sumsq, 1e-24))       # [TB, D]

        # ClassificationHead: dense1 -> tanh -> dense2 -> tanh -> out_proj
        # (all output dims lane-padded to 128; padded lanes carry exact zeros).
        x = jnp.tanh(jnp.dot(q, w1_ref[...],
                             preferred_element_type=jnp.float32) + b1_ref[...])
        x = jnp.tanh(jnp.dot(x, w2_ref[...],
                             preferred_element_type=jnp.float32) + b2_ref[...])
        x = jnp.dot(x, w3_ref[...],
                    preferred_element_type=jnp.float32) + b3_ref[...]
        o_ref[...] = x.astype(o_ref.dtype)


def simclr_classifier_forward(h, mask, params):
    """h: [B, S, D] f32 hidden states, mask: [B, S] f32 (0/1), params: dict."""
    B, S, D = h.shape
    w1, b1 = params["w1"], params["b1"]   # [D, D//4],     [1, D//4]
    w2, b2 = params["w2"], params["b2"]   # [D//4, D//16], [1, D//16]
    w3, b3 = params["w3"], params["b3"]   # [D//16, C],    [1, C]
    d1, d2, C = w1.shape[1], w2.shape[1], w3.shape[1]

    # Lane-pad the tiny head dims to multiples of 128 so the MXU matmuls and
    # output stores run unmasked. Biases are zero-padded too, so padded lanes
    # stay exactly zero (tanh(0) == 0) and cannot leak into the real outputs.
    d1p, d2p, cp = _round_up(d1), _round_up(d2), _round_up(C)
    w1p, b1p = _pad2(w1, D, d1p),   _pad2(b1, 1, d1p)
    w2p, b2p = _pad2(w2, d1p, d2p), _pad2(b2, 1, d2p)
    w3p, b3p = _pad2(w3, d2p, cp),  _pad2(b3, 1, cp)

    # Halve HBM traffic of the memory-bound pooling stage; accumulate in f32.
    h_bf = h.astype(jnp.bfloat16)
    m_bf = mask.astype(jnp.bfloat16)

    # Batch tile ("parallel" -> megacore-shardable) and sequence tile
    # (streamed reduction, last grid axis). Sized so double-buffered bf16
    # tiles stay far inside v7x's 64 MiB VMEM.
    TB = _pick_tile(B, (256, 128))
    TS = _pick_tile(S, (512, 256, 128))
    grid = (B // TB, S // TS)

    def resident(shape):
        # Same block for every grid step -> stays resident in VMEM (no re-DMA).
        return pl.BlockSpec(shape, lambda b, s: (0,) * len(shape))

    out_full = pl.pallas_call(
        _simclr_classifier_kernel,
        out_shape=jax.ShapeDtypeStruct((B, cp), jnp.float32),
        grid=grid,
        in_specs=[
            pl.BlockSpec((TB, TS, D), lambda b, s: (b, s, 0)),   # hidden states
            pl.BlockSpec((TB, TS), lambda b, s: (b, s)),         # attention mask
            resident((D, d1p)),   resident((1, d1p)),
            resident((d1p, d2p)), resident((1, d2p)),
            resident((d2p, cp)),  resident((1, cp)),
        ],
        out_specs=pl.BlockSpec((TB, cp), lambda b, s: (b, 0)),
        scratch_shapes=[
            pltpu.VMEM((TB, D), jnp.float32),   # masked-sum accumulator
            pltpu.VMEM((TB, 1), jnp.float32),   # token-count accumulator
        ],
        compiler_params=pltpu.CompilerParams(
            dimension_semantics=("parallel", "arbitrary"),
            vmem_limit_bytes=48 * 1024 * 1024,
        ),
    )(h_bf, m_bf, w1p, b1p, w2p, b2p, w3p, b3p)

    return out_full[:, :C]


def _xavier_uniform(key, fan_in, fan_out, dtype=jnp.float32):
    limit = (6.0 / (fan_in + fan_out)) ** 0.5
    # stored [in, out] (transposed w.r.t. PyTorch nn.Linear weight [out, in])
    return jax.random.uniform(key, (fan_in, fan_out), dtype,
                              minval=-limit, maxval=limit)


def init_params(key, in_dim, out_dim):
    d1, d2 = in_dim // 4, in_dim // 16
    k = jax.random.split(key, 6)
    return {
        "w1": _xavier_uniform(k[0], in_dim, d1),
        "b1": 1e-6 * jax.random.normal(k[1], (1, d1), jnp.float32),
        "w2": _xavier_uniform(k[2], d1, d2),
        "b2": 1e-6 * jax.random.normal(k[3], (1, d2), jnp.float32),
        "w3": _xavier_uniform(k[4], d2, out_dim),
        "b3": 1e-6 * jax.random.normal(k[5], (1, out_dim), jnp.float32),
    }


if __name__ == "__main__":
    # Small shapes: batch=2, seq=8, projection_size=64, classifier_dim=2
    B, S, D, C = 2, 8, 64, 2

    key = jax.random.PRNGKey(0)
    k_h, k_m, k_p = jax.random.split(key, 3)

    hidden_states = jax.random.normal(k_h, (B, S, D), jnp.float32)
    # deterministic mask: first row keeps 6 tokens, second row keeps all 8
    attention_mask = jnp.array(
        [[1, 1, 1, 1, 1, 1, 0, 0],
         [1, 1, 1, 1, 1, 1, 1, 1]], dtype=jnp.float32)

    params = init_params(k_p, D, C)

    out = simclr_classifier_forward(hidden_states, attention_mask, params)
    out = jax.block_until_ready(out)

    # Reference in plain JAX (h goes through the same bf16 boundary cast).
    h_ref = hidden_states.astype(jnp.bfloat16).astype(jnp.float32)
    masked = h_ref * attention_mask[:, :, None]
    pooled = masked.sum(1) / jnp.maximum(attention_mask.sum(1, keepdims=True), 1e-9)
    q = pooled / jnp.maximum(
        jnp.sqrt((pooled * pooled).sum(-1, keepdims=True)), 1e-12)
    x = jnp.tanh(q @ params["w1"] + params["b1"])
    x = jnp.tanh(x @ params["w2"] + params["b2"])
    ref = x @ params["w3"] + params["b3"]

    assert out.shape == (B, C)
    assert jnp.allclose(out, ref, atol=1e-3, rtol=1e-3), (out, ref)

    print("KERNEL_OK")
</pallas_src>

<mosaic_0001>
module attributes {stable_mosaic.version = 11 : i64} {
  func.func @_simclr_classifier_kernel(%arg0: i32, %arg1: i32, %arg2: memref<2x8x64xbf16, #tpu.memory_space<vmem>>, %arg3: memref<2x8xbf16, #tpu.memory_space<vmem>>, %arg4: memref<64x128xf32, #tpu.memory_space<vmem>>, %arg5: memref<1x128xf32, #tpu.memory_space<vmem>>, %arg6: memref<128x128xf32, #tpu.memory_space<vmem>>, %arg7: memref<1x128xf32, #tpu.memory_space<vmem>>, %arg8: memref<128x128xf32, #tpu.memory_space<vmem>>, %arg9: memref<1x128xf32, #tpu.memory_space<vmem>>, %arg10: memref<2x128xf32, #tpu.memory_space<vmem>>, %arg11: memref<2x64xf32, #tpu.memory_space<vmem>>, %arg12: memref<2x1xf32, #tpu.memory_space<vmem>>) attributes {dimension_semantics = [#tpu.dimension_semantics<parallel>, #tpu.dimension_semantics<arbitrary>], iteration_bounds = array<i64: 1, 1>, scalar_prefetch = 0 : i64, scratch_operands = 2 : i64, tpu.core_type = #tpu.core_type<tc>, window_params = [{transform_indices = @transform_0, window_bounds = array<i64: 2, 8, 64>}, {transform_indices = @transform_1, window_bounds = array<i64: 2, 8>}, {pipeline_mode = #tpu.pipeline_mode<synchronous>, transform_indices = @transform_2, window_bounds = array<i64: 64, 128>}, {pipeline_mode = #tpu.pipeline_mode<synchronous>, transform_indices = @transform_3, window_bounds = array<i64: 1, 128>}, {pipeline_mode = #tpu.pipeline_mode<synchronous>, transform_indices = @transform_4, window_bounds = array<i64: 128, 128>}, {pipeline_mode = #tpu.pipeline_mode<synchronous>, transform_indices = @transform_5, window_bounds = array<i64: 1, 128>}, {pipeline_mode = #tpu.pipeline_mode<synchronous>, transform_indices = @transform_6, window_bounds = array<i64: 128, 128>}, {pipeline_mode = #tpu.pipeline_mode<synchronous>, transform_indices = @transform_7, window_bounds = array<i64: 1, 128>}, {transform_indices = @transform_8, window_bounds = array<i64: 2, 128>}]} {
    %c0_i32 = arith.constant 0 : i32
    %0 = arith.cmpi eq, %arg1, %c0_i32 : i32
    %1 = arith.extui %0 : i1 to i32
    %c0_i32_0 = arith.constant 0 : i32
    %2 = arith.cmpi ne, %1, %c0_i32_0 : i32
    scf.if %2 {
      %cst_16 = arith.constant 0.000000e+00 : f32
      %20 = vector.broadcast %cst_16 : f32 to vector<2x64xf32>
      %c0_17 = arith.constant 0 : index
      %c0_18 = arith.constant 0 : index
      %21 = vector.load %arg11[%c0_17, %c0_18] : memref<2x64xf32, #tpu.memory_space<vmem>>, vector<2x64xf32>
      tpu.vector_store %arg11[%c0_17, %c0_18], %20 {strides = array<i32>} : memref<2x64xf32, #tpu.memory_space<vmem>>, vector<2x64xf32>,
      %cst_19 = arith.constant 0.000000e+00 : f32
      %22 = vector.broadcast %cst_19 : f32 to vector<2x1xf32>
      %c0_20 = arith.constant 0 : index
      %c0_21 = arith.constant 0 : index
      %23 = vector.load %arg12[%c0_20, %c0_21] : memref<2x1xf32, #tpu.memory_space<vmem>>, vector<2x1xf32>
      tpu.vector_store %arg12[%c0_20, %c0_21], %22 {strides = array<i32>} : memref<2x1xf32, #tpu.memory_space<vmem>>, vector<2x1xf32>,
    } else {
    }
    %c0 = arith.constant 0 : index
    %c0_1 = arith.constant 0 : index
    %3 = vector.load %arg3[%c0, %c0_1] : memref<2x8xbf16, #tpu.memory_space<vmem>>, vector<2x8xbf16>
    %c0_2 = arith.constant 0 : index
    %c0_3 = arith.constant 0 : index
    %c0_4 = arith.constant 0 : index
    %4 = vector.load %arg2[%c0_2, %c0_3, %c0_4] : memref<2x8x64xbf16, #tpu.memory_space<vmem>>, vector<2x8x64xbf16>
    %5 = vector.shape_cast %3 : vector<2x8xbf16> to vector<2x1x8xbf16>
    "tpu.trace_start"() <{level = 10 : i32, message = "bqs,bsd->bqd"}> : () -> ()
    %cst = arith.constant dense<0.000000e+00> : vector<2x1x64xf32>
    %6 = tpu.matmul %5, %4, %cst {dimension_numbers = #tpu.dot_dimension_numbers<[2], [1], [1], [2], [0, 0, 0, 1, 1, 2], [0], [0]>} : vector<2x1x8xbf16>, vector<2x8x64xbf16>, vector<2x1x64xf32> -> vector<2x1x64xf32>
    "tpu.trace_stop"() : () -> ()
    %c0_5 = arith.constant 0 : index
    %c0_6 = arith.constant 0 : index
    %7 = vector.load %arg11[%c0_5, %c0_6] : memref<2x64xf32, #tpu.memory_space<vmem>>, vector<2x64xf32>
    %8 = vector.shape_cast %6 : vector<2x1x64xf32> to vector<2x64xf32>
    %9 = arith.addf %7, %8 : vector<2x64xf32>
    %c0_7 = arith.constant 0 : index
    %c0_8 = arith.constant 0 : index
    %10 = vector.load %arg11[%c0_7, %c0_8] : memref<2x64xf32, #tpu.memory_space<vmem>>, vector<2x64xf32>
    tpu.vector_store %arg11[%c0_7, %c0_8], %9 {strides = array<i32>} : memref<2x64xf32, #tpu.memory_space<vmem>>, vector<2x64xf32>,
    %c0_9 = arith.constant 0 : index
    %c0_10 = arith.constant 0 : index
    %11 = vector.load %arg12[%c0_9, %c0_10] : memref<2x1xf32, #tpu.memory_space<vmem>>, vector<2x1xf32>
    %12 = arith.extf %3 : vector<2x8xbf16> to vector<2x8xf32>
    %cst_11 = arith.constant dense<0.000000e+00> : vector<2xf32>
    %13 = vector.multi_reduction <add>, %12, %cst_11 [1] : vector<2x8xf32> to vector<2xf32>
    %14 = vector.shape_cast %13 : vector<2xf32> to vector<2x1xf32>
    %15 = arith.addf %11, %14 : vector<2x1xf32>
    %c0_12 = arith.constant 0 : index
    %c0_13 = arith.constant 0 : index
    %16 = vector.load %arg12[%c0_12, %c0_13] : memref<2x1xf32, #tpu.memory_space<vmem>>, vector<2x1xf32>
    tpu.vector_store %arg12[%c0_12, %c0_13], %15 {strides = array<i32>} : memref<2x1xf32, #tpu.memory_space<vmem>>, vector<2x1xf32>,
    %c0_i32_14 = arith.constant 0 : i32
    %17 = arith.cmpi eq, %arg1, %c0_i32_14 : i32
    %18 = arith.extui %17 : i1 to i32
    %c0_i32_15 = arith.constant 0 : i32
    %19 = arith.cmpi ne, %18, %c0_i32_15 : i32
    scf.if %19 {
      %c0_16 = arith.constant 0 : index
      %c0_17 = arith.constant 0 : index
      %20 = vector.load %arg12[%c0_16, %c0_17] : memref<2x1xf32, #tpu.memory_space<vmem>>, vector<2x1xf32>
      %cst_18 = arith.constant 9.99999971E-10 : f32
      %21 = vector.broadcast %cst_18 : f32 to vector<2x1xf32>
      %22 = arith.maximumf %20, %21 : vector<2x1xf32>
      %23 = tpu.reciprocal %22 {approx = true} : vector<2x1xf32> -> vector<2x1xf32>
      %c0_19 = arith.constant 0 : index
      %c0_20 = arith.constant 0 : index
      %24 = vector.load %arg11[%c0_19, %c0_20] : memref<2x64xf32, #tpu.memory_space<vmem>>, vector<2x64xf32>
      %25 = vector.broadcast %23 : vector<2x1xf32> to vector<2x64xf32>
      %26 = arith.mulf %24, %25 : vector<2x64xf32>
      %27 = arith.mulf %26, %26 : vector<2x64xf32>
      %cst_21 = arith.constant dense<0.000000e+00> : vector<2xf32>
      %28 = vector.multi_reduction <add>, %27, %cst_21 [1] : vector<2x64xf32> to vector<2xf32>
      %29 = vector.shape_cast %28 : vector<2xf32> to vector<2x1xf32>
      %cst_22 = arith.constant 1.000000e-24 : f32
      %30 = vector.broadcast %cst_22 : f32 to vector<2x1xf32>
      %31 = arith.maximumf %29, %30 : vector<2x1xf32>
      %32 = math.rsqrt %31 : vector<2x1xf32>
      %33 = vector.broadcast %32 : vector<2x1xf32> to vector<2x64xf32>
      %34 = arith.mulf %26, %33 : vector<2x64xf32>
      %c0_23 = arith.constant 0 : index
      %c0_24 = arith.constant 0 : index
      %35 = vector.load %arg4[%c0_23, %c0_24] : memref<64x128xf32, #tpu.memory_space<vmem>>, vector<64x128xf32>
      %cst_25 = arith.constant dense<0.000000e+00> : vector<2x128xf32>
      %36 = tpu.matmul %34, %35, %cst_25 {dimension_numbers = #tpu.dot_dimension_numbers<[1], [0], [0], [1], [0, 0, 1, 1], [], []>} : vector<2x64xf32>, vector<64x128xf32>, vector<2x128xf32> -> vector<2x128xf32>
      %c0_26 = arith.constant 0 : index
      %c0_27 = arith.constant 0 : index
      %37 = vector.load %arg5[%c0_26, %c0_27] : memref<1x128xf32, #tpu.memory_space<vmem>>, vector<1x128xf32>
      %38 = vector.broadcast %37 : vector<1x128xf32> to vector<2x128xf32>
      %39 = arith.addf %36, %38 : vector<2x128xf32>
      %40 = math.tanh %39 : vector<2x128xf32>
      %c0_28 = arith.constant 0 : index
      %c0_29 = arith.constant 0 : index
      %41 = vector.load %arg6[%c0_28, %c0_29] : memref<128x128xf32, #tpu.memory_space<vmem>>, vector<128x128xf32>
      %cst_30 = arith.constant dense<0.000000e+00> : vector<2x128xf32>
      %42 = tpu.matmul %40, %41, %cst_30 {dimension_numbers = #tpu.dot_dimension_numbers<[1], [0], [0], [1], [0, 0, 1, 1], [], []>} : vector<2x128xf32>, vector<128x128xf32>, vector<2x128xf32> -> vector<2x128xf32>
      %c0_31 = arith.constant 0 : index
      %c0_32 = arith.constant 0 : index
      %43 = vector.load %arg7[%c0_31, %c0_32] : memref<1x128xf32, #tpu.memory_space<vmem>>, vector<1x128xf32>
      %44 = vector.broadcast %43 : vector<1x128xf32> to vector<2x128xf32>
      %45 = arith.addf %42, %44 : vector<2x128xf32>
      %46 = math.tanh %45 : vector<2x128xf32>
      %c0_33 = arith.constant 0 : index
      %c0_34 = arith.constant 0 : index
      %47 = vector.load %arg8[%c0_33, %c0_34] : memref<128x128xf32, #tpu.memory_space<vmem>>, vector<128x128xf32>
      %cst_35 = arith.constant dense<0.000000e+00> : vector<2x128xf32>
      %48 = tpu.matmul %46, %47, %cst_35 {dimension_numbers = #tpu.dot_dimension_numbers<[1], [0], [0], [1], [0, 0, 1, 1], [], []>} : vector<2x128xf32>, vector<128x128xf32>, vector<2x128xf32> -> vector<2x128xf32>
      %c0_36 = arith.constant 0 : index
      %c0_37 = arith.constant 0 : index
      %49 = vector.load %arg9[%c0_36, %c0_37] : memref<1x128xf32, #tpu.memory_space<vmem>>, vector<1x128xf32>
      %50 = vector.broadcast %49 : vector<1x128xf32> to vector<2x128xf32>
      %51 = arith.addf %48, %50 : vector<2x128xf32>
      %c0_38 = arith.constant 0 : index
      %c0_39 = arith.constant 0 : index
      %52 = vector.load %arg10[%c0_38, %c0_39] : memref<2x128xf32, #tpu.memory_space<vmem>>, vector<2x128xf32>
      tpu.vector_store %arg10[%c0_38, %c0_39], %51 {strides = array<i32>} : memref<2x128xf32, #tpu.memory_space<vmem>>, vector<2x128xf32>,
    } else {
    }
    return
  }
  func.func @transform_0(%arg0: i32, %arg1: i32) -> (i32, i32, i32) {
    %c0_i32 = arith.constant 0 : i32
    %c0_i32_0 = arith.constant 0 : i32
    return %arg0, %arg1, %c0_i32 : i32, i32, i32
  }
  func.func @transform_1(%arg0: i32, %arg1: i32) -> (i32, i32) {
    %c0_i32 = arith.constant 0 : i32
    return %arg0, %arg1 : i32, i32
  }
  func.func @transform_2(%arg0: i32, %arg1: i32) -> (i32, i32) {
    %c0_i32 = arith.constant 0 : i32
    %c0_i32_0 = arith.constant 0 : i32
    %c0_i32_1 = arith.constant 0 : i32
    return %c0_i32, %c0_i32_0 : i32, i32
  }
  func.func @transform_3(%arg0: i32, %arg1: i32) -> (i32, i32) {
    %c0_i32 = arith.constant 0 : i32
    %c0_i32_0 = arith.constant 0 : i32
    %c0_i32_1 = arith.constant 0 : i32
    return %c0_i32, %c0_i32_0 : i32, i32
  }
  func.func @transform_4(%arg0: i32, %arg1: i32) -> (i32, i32) {
    %c0_i32 = arith.constant 0 : i32
    %c0_i32_0 = arith.constant 0 : i32
    %c0_i32_1 = arith.constant 0 : i32
    return %c0_i32, %c0_i32_0 : i32, i32
  }
  func.func @transform_5(%arg0: i32, %arg1: i32) -> (i32, i32) {
    %c0_i32 = arith.constant 0 : i32
    %c0_i32_0 = arith.constant 0 : i32
    %c0_i32_1 = arith.constant 0 : i32
    return %c0_i32, %c0_i32_0 : i32, i32
  }
  func.func @transform_6(%arg0: i32, %arg1: i32) -> (i32, i32) {
    %c0_i32 = arith.constant 0 : i32
    %c0_i32_0 = arith.constant 0 : i32
    %c0_i32_1 = arith.constant 0 : i32
    return %c0_i32, %c0_i32_0 : i32, i32
  }
  func.func @transform_7(%arg0: i32, %arg1: i32) -> (i32, i32) {
    %c0_i32 = arith.constant 0 : i32
    %c0_i32_0 = arith.constant 0 : i32
    %c0_i32_1 = arith.constant 0 : i32
    return %c0_i32, %c0_i32_0 : i32, i32
  }
  func.func @transform_8(%arg0: i32, %arg1: i32) -> (i32, i32) {
    %c0_i32 = arith.constant 0 : i32
    %c0_i32_0 = arith.constant 0 : i32
    return %arg0, %c0_i32 : i32, i32
  }
}

</mosaic_0001>

<bundles_post_ra>
// kernel: tpu_custom_call.1
= control target key start
LH: loop header
LB: loop body
LE: loop exit
PB: predicated region body
PF: predicated region fallthrough
CT: control target
= control target key end

     0   :  { %13 = vsyncpa [#allocation5], 0  ;;  %s974_s0 = inlined_call_operand.hbm [shape: bf16[2,8,64], index: 0, kind: input, shape index: {}]   ;;  %s975_s1 = inlined_call_operand.vmem [shape: bf16[2,8], index: 1, kind: input, shape index: {}]   ;;  %s976_s2 = inlined_call_operand.hbm [shape: f32[64,128], index: 2, kind: input, shape index: {}]   ;;  %s977_s3 = inlined_call_operand.vmem [shape: f32[1,128], index: 3, kind: input, shape index: {}]   ;;  %s978_s4 = inlined_call_operand.hbm [shape: f32[128,128], index: 4, kind: input, shape index: {}]   ;;  %s979_s5 = inlined_call_operand.vmem [shape: f32[1,128], index: 5, kind: input, shape index: {}]   ;;  %s980_s6 = inlined_call_operand.hbm [shape: f32[128,128], index: 6, kind: input, shape index: {}]   ;;  %s981_s7 = inlined_call_operand.vmem [shape: f32[1,128], index: 7, kind: input, shape index: {}]   ;;  %s982_s8 = inlined_call_operand.hbm [shape: f32[2,128], index: 8, kind: output, shape index: {}]  }
   0x1   :  { %14 = vsyncpa [#allocation8], 0 }
   0x2   :  { %15 = vsyncpa [#allocation11], 0 }
   0x3   :  { %16 = vsyncpa [#allocation6], 0  ;;  %s822_s27 = smov [#allocation7]  }
   0x4   :  { %s36_s28 = sshll.u32 %s822_s27, 4  ;;  %s37_s28 = int_to_ptr.vmem [resolvable:$true] %s36_s28 }
   0x5   :  { %s722_s29 = scalar_lea.vmem %s37_s28, 1024  ;;  %p727_p1 = scmp.lt.s32.totalorder %s37_s28, %s37_s28 }
   0x6   :  { %p723_p0 = scmp.ne.s32.totalorder %s37_s28, %s722_s29  ;;  %p728_p2 = scmp.lt.s32.totalorder %s722_s29, %s722_s29 }
   0x8   :  { %p729_p3 = por %p728_p2, %p727_p1 }
   0xa   :  { %p730_p4 = pnand %p729_p3, %p723_p0 }
   0xc   :  { %733 = shalt.err (!%p730_p4)
}
   0xd   :  { %s823_s30 = smov 128   ;;  %s824_s9 = smov 8  }
   0xe   :  { %42 = dma.hbm_to_vmem [thread:$0]  %s976_s2, 1024, %s37_s28, [#allocation8], %s823_s30, %s823_s30, %s824_s9  }
   0xf   :  { %s825_s12 = smov [#allocation4]  }
  0x10   :  { %s22_s13 = sshll.u32 %s825_s12, 4  ;;  %s23_s13 = int_to_ptr.vmem [resolvable:$true] %s22_s13 }
  0x11   :  { %s742_s14 = scalar_lea.vmem %s23_s13, 128  ;;  %p747_p6 = scmp.lt.s32.totalorder %s23_s13, %s23_s13 }
  0x12   :  { %p743_p5 = scmp.ne.s32.totalorder %s23_s13, %s742_s14  ;;  %p748_p7 = scmp.lt.s32.totalorder %s742_s14, %s742_s14 }
  0x14   :  { %p749_p8 = por %p748_p7, %p747_p6 }
  0x16   :  { %p750_p9 = pnand %p749_p8, %p743_p5 }
  0x18   :  { %753 = shalt.err (!%p750_p9)
}
  0x19   :  { %s826_s15 = smov 64   ;;  %s827_s16 = smov 4  }
  0x1a   :  { %28 = dma.hbm_to_vmem [thread:$0]  %s974_s0, 128, %s23_s13, [#allocation5], %s826_s15, %s826_s15, %s827_s16  }
  0x1b   :  { %s828_s19 = smov [#allocation9]   ;;  %s829_s21 = smov [#allocation10]  }
  0x1c   :  { %s50_s20 = sshll.u32 %s828_s19, 4  ;;  %s64_s2 = sshll.u32 %s829_s21, 4  ;;  %s51_s20 = int_to_ptr.vmem [resolvable:$true] %s50_s20  ;;  %s65_s2 = int_to_ptr.vmem [resolvable:$true] %s64_s2 }
  0x1d   :  { %s762_s22 = scalar_lea.vmem %s51_s20, 2048  ;;  %p767_p11 = scmp.lt.s32.totalorder %s51_s20, %s51_s20 }
  0x1e   :  { %p763_p10 = scmp.ne.s32.totalorder %s51_s20, %s762_s22  ;;  %p768_p12 = scmp.lt.s32.totalorder %s762_s22, %s762_s22 }
  0x20   :  { %p769_p13 = por %p768_p12, %p767_p11 }
  0x22   :  { %p770_p0 = pnand %p769_p13, %p763_p10 }
  0x24   :  { %773 = shalt.err (!%p770_p0)
}
  0x25   :  { %56 = dma.hbm_to_vmem [thread:$0]  %s978_s4, 2048, %s51_s20, [#allocation8], %s823_s30, %s823_s30, %s824_s9  }
  0x26   :  { %s782_s0 = scalar_lea.vmem %s65_s2, 2048  ;;  %p787_p2 = scmp.lt.s32.totalorder %s65_s2, %s65_s2 }
  0x27   :  { %p783_p1 = scmp.ne.s32.totalorder %s65_s2, %s782_s0  ;;  %p788_p3 = scmp.lt.s32.totalorder %s782_s0, %s782_s0 }
  0x29   :  { %p789_p4 = por %p788_p3, %p787_p2 }
  0x2b   :  { %p790_p5 = pnand %p789_p4, %p783_p1 }
  0x2d   :  { %793 = shalt.err (!%p790_p5)
}
  0x2e   :  { %70 = dma.hbm_to_vmem [thread:$0]  %s980_s6, 2048, %s65_s2, [#allocation11], %s823_s30, %s823_s30, %s824_s9  }
  0x2f   :  { %814 = dma.done.wait [#allocation5], 128  }
  0x30   :  { %815 = vsyncadd [#allocation5], 4294967168 }
  0x31   :  { %816 = dma.done.wait [#allocation8], 3072  }
  0x32   :  { %817 = vsyncadd [#allocation8], 4294964224 }
  0x33   :  { %818 = dma.done.wait [#allocation11], 2048  }
  0x34   :  { %819 = vsyncadd [#allocation11], 4294965248  ;;  %v101_v0 = vlaneseq  ;;  %v830_v1 = vmov 0.0   ;;  %vm92_vm0 = vcmask 1024   ;;  %vm831_vm1 = vmmov 0   ;;  %v250_v40 = vld [vmem:[#allocation7 + $0x38] sm:$0xff] }
  0x35   :  { %592 = vmatprep.subr.bf16.mxu1 %v830_v1  ;;  %604 = vmatprep.subr.mxu0 %v830_v1  ;;  %93 = vst.msk [vmem:[#allocation3] sm:$0x3] %vm92_vm0, %v830_v1  ;;  %vm109_vm2 = vcmask 1043456   ;;  %vm216_vm3 = vcmask 58368   ;;  %v94_v4 = vld [vmem:[%s975_s1] sm:$0x1] }
  0x36   :  { %v102_v2 = vshrl.u32 %v101_v0, 7  ;;  %594 = vmatprep.mubr.msk.bf16.mxu1 %vm831_vm1, %v830_v1  ;;  %620 = vmatprep.mubr.msk.f32.mxu0 %vm831_vm1, %v830_v1  ;;  %v95_v5 = vld [vmem:[#allocation4] sm:$0xf]  ;;  %v96_v6 = vld [vmem:[#allocation4 + $0x4] sm:$0xf]  ;;  %v215_v7 = vunpack.c.l.bf16 %v94_v4  ;;  %v99_v8 = vunpack.i.h.s16 %v94_v4  ;;  %v538_v9 = vpack.i.b16 %v94_v4, %v94_v4  ;;  %v249_v41 = vld [vmem:[#allocation7 + $0x30] sm:$0xff] }
  0x37   :  { %v111_v10 = vsel %vm109_vm2, %v95_v5, 0  ;;  %vm105_vm4 = vcmask 64512   ;;  %v162_v12 = vsel %vm109_vm2, %v96_v6, 0  ;;  %v832_v16 = vmov 0   ;;  %605 = vmatpush3.msra.mxu0 %v250_v40  ;;  %v248_v42 = vld [vmem:[#allocation7 + $0x28] sm:$0xff]  ;;  %v247_v43 = vld [vmem:[#allocation7 + $0x20] sm:$0xff] }
  0x38   :  { %v103_v3 = vsub.s32 0, %v102_v2  ;;  %593 = vmatpush3.bf16.msra.mxu1 %v111_v10  ;;  %v217_v11 = vsel %vm216_vm3, %v215_v7, 0.0  ;;  %v153_v14 = vpack.i.b16 %v99_v8, %v99_v8  ;;  %705 = vset.pattern.permute.xlu0 %v832_v16  ;;  %vm90_vm5 = vcmask 517120   ;;  %v246_v44 = vld [vmem:[#allocation7 + $0x18] sm:$0xff]  ;;  %v245_v45 = vld [vmem:[#allocation7 + $0x10] sm:$0xff]  ;;  %v244_v46 = vld [vmem:[#allocation7 + $0x8] sm:$0xff] }
  0x39   :  { %598 = vmatprep.subr.bf16.mxu1 %v830_v1  ;;  %218 = vadd.xlane.f32.xlu0 %v217_v11  ;;  %91 = vst.msk [vmem:[#allocation2] sm:$0x3] %vm90_vm5, %v830_v1  ;;  %vm208_vm6 = vcmask 1041409   ;;  %v243_v47 = vld [vmem:[#allocation7] sm:$0xff]  ;;  %v348_v48 = vld [vmem:[#allocation9 + $0x78] sm:$0xff]  ;;  %v347_v49 = vld [vmem:[#allocation9 + $0x70] sm:$0xff] }
  0x3a   :  { %v104_v13 = vrot.slane %v538_v9, %v103_v3  ;;  %v157_v15 = vrot.slane %v153_v14, %v103_v3  ;;  %606 = vmatprep.subr.mxu0 %v830_v1  ;;  %v346_v50 = vld [vmem:[#allocation9 + $0x68] sm:$0xff]  ;;  %v345_v51 = vld [vmem:[#allocation9 + $0x60] sm:$0xff]  ;;  %v344_v52 = vld [vmem:[#allocation9 + $0x58] sm:$0xff]  ;;  %vm258_vm7 = vcmask 523264   ;;  %s833_s9 = smov [#allocation12]  }
  0x3b   :  { %607 = vmatpush3.msra.mxu0 %v249_v41  ;;  %v343_v53 = vld [vmem:[#allocation9 + $0x50] sm:$0xff]  ;;  %v342_v54 = vld [vmem:[#allocation9 + $0x48] sm:$0xff]  ;;  %v341_v59 = vld [vmem:[#allocation9 + $0x40] sm:$0xff]  ;;  %s527_s10 = sshll.u32 %s833_s9, 4  ;;  %s528_s10 = int_to_ptr.vmem [resolvable:$true] %s527_s10 }
  0x3c   :  { %595 = vmatmul.mubr.msk.bf16.vlgmr.msra.gmra.mxu1 %vm105_vm4, %v104_v13  ;;  %v214_v17 = vld [vmem:[#allocation3] sm:$0x3]  ;;  %608 = vmatprep.subr.mxu0 %v830_v1  ;;  %v340_v60 = vld [vmem:[#allocation9 + $0x38] sm:$0xff]  ;;  %v338_v62 = vld [vmem:[#allocation9 + $0x28] sm:$0xff]  ;;  %s794_s11 = scalar_lea.vmem %s528_s10, 32  ;;  %p799_p7 = scmp.lt.s32.totalorder %s528_s10, %s528_s10 }
  0x3d   :  { %599 = vmatpush3.bf16.msra.mxu1 %v162_v12  ;;  %600 = vmatprep.mubr.msk.bf16.mxu1 %vm831_vm1, %v830_v1  ;;  %v339_v61 = vld [vmem:[#allocation9 + $0x30] sm:$0xff]  ;;  %v337_v63 = vld [vmem:[#allocation9 + $0x20] sm:$0xff]  ;;  %v336_v0 = vld [vmem:[#allocation9 + $0x18] sm:$0xff]  ;;  %p795_p6 = scmp.ne.s32.totalorder %s528_s10, %s794_s11  ;;  %p800_p8 = scmp.lt.s32.totalorder %s794_s11, %s794_s11 }
  0x3e   :  { %623 = vmatprep.subr.mxu1 %v830_v1  ;;  %609 = vmatpush3.msra.mxu0 %v248_v42  ;;  %v335_v2 = vld [vmem:[#allocation9 + $0x10] sm:$0xff]  ;;  %v334_v3 = vld [vmem:[#allocation9 + $0x8] sm:$0xff]  ;;  %v333_v4 = vld [vmem:[#allocation9] sm:$0xff] }
  0x3f   :  { %610 = vmatprep.subr.mxu0 %v830_v1  ;;  %v442_v5 = vld [vmem:[#allocation10 + $0x78] sm:$0xff]  ;;  %v441_v6 = vld [vmem:[#allocation10 + $0x70] sm:$0xff]  ;;  %v440_v7 = vld [vmem:[#allocation10 + $0x68] sm:$0xff]  ;;  %p801_p9 = por %p800_p8, %p799_p7 }
  0x40   :  { %v204_v29 = vld [vmem:[#allocation2] sm:$0x3]  ;;  %611 = vmatpush3.msra.mxu0 %v247_v43  ;;  %v439_v8 = vld [vmem:[#allocation10 + $0x60] sm:$0xff]  ;;  %v438_v9 = vld [vmem:[#allocation10 + $0x58] sm:$0xff] }
  0x41   :  { %612 = vmatprep.subr.mxu0 %v830_v1  ;;  %v437_v10 = vld [vmem:[#allocation10 + $0x50] sm:$0xff]  ;;  %v436_v11 = vld [vmem:[#allocation10 + $0x48] sm:$0xff]  ;;  %p802_p10 = pnand %p801_p9, %p795_p6 }
  0x42   :  { %613 = vmatpush3.msra.mxu0 %v246_v44  ;;  %v541_v12 = vld [vmem:[%s977_s3] ss:$0 sm:$0xff] }
  0x43   :  { %614 = vmatprep.subr.mxu0 %v830_v1 }
  0x44   :  { %601 = vmatmul.mubr.msk.bf16.vlgmr.msra.gmra.mxu1 %vm105_vm4, %v157_v15  ;;  %615 = vmatpush3.msra.mxu0 %v245_v45 }
  0x45   :  { %655 = vmatprep.mubr.msk.f32.mxu1 %vm831_vm1, %v830_v1  ;;  %616 = vmatprep.subr.mxu0 %v830_v1 }
  0x46   :  { %617 = vmatpush3.msra.mxu0 %v244_v46  ;;  %624 = vmatpush3.msra.mxu1 %v348_v48 }
  0x47   :  { %618 = vmatprep.subr.mxu0 %v830_v1  ;;  %625 = vmatprep.subr.mxu1 %v830_v1 }
  0x48   :  { %619 = vmatpush3.msra.mxu0 %v243_v47  ;;  %626 = vmatpush3.msra.mxu1 %v347_v49 }
  0x49   :  { %658 = vmatprep.subr.mxu0 %v830_v1  ;;  %627 = vmatprep.subr.mxu1 %v830_v1 }
  0x4a   :  { %628 = vmatpush3.msra.mxu1 %v346_v50 }
  0x4b   :  { %629 = vmatprep.subr.mxu1 %v830_v1 }
  0x4c   :  { %630 = vmatpush3.msra.mxu1 %v345_v51 }
  0x4d   :  { %631 = vmatprep.subr.mxu1 %v830_v1 }
  0x4e   :  { %632 = vmatpush3.msra.mxu1 %v344_v52 }
  0x4f   :  { %633 = vmatprep.subr.mxu1 %v830_v1 }
  0x50   :  { %634 = vmatpush3.msra.mxu1 %v343_v53 }
  0x51   :  { %635 = vmatprep.subr.mxu1 %v830_v1 }
  0x52   :  { %636 = vmatpush3.msra.mxu1 %v342_v54 }
  0x53   :  { %637 = vmatprep.subr.mxu1 %v830_v1 }
  0x54   :  { %638 = vmatpush3.msra.mxu1 %v341_v59 }
  0x55   :  { %639 = vmatprep.subr.mxu1 %v830_v1 }
  0x56   :  { %640 = vmatpush3.msra.mxu1 %v340_v60 }
  0x57   :  { %641 = vmatprep.subr.mxu1 %v830_v1 }
  0x58   :  { %642 = vmatpush3.msra.mxu1 %v339_v61 }
  0x59   :  { %643 = vmatprep.subr.mxu1 %v830_v1 }
  0x5a   :  { %644 = vmatpush3.msra.mxu1 %v338_v62 }
  0x5b   :  { %645 = vmatprep.subr.mxu1 %v830_v1 }
  0x5c   :  { %646 = vmatpush3.msra.mxu1 %v337_v63 }
  0x5d   :  { %647 = vmatprep.subr.mxu1 %v830_v1 }
  0x5e   :  { %648 = vmatpush3.msra.mxu1 %v336_v0 }
  0x5f   :  { %649 = vmatprep.subr.mxu1 %v830_v1 }
  0x60   :  { %650 = vmatpush3.msra.mxu1 %v335_v2 }
  0x61   :  { %651 = vmatprep.subr.mxu1 %v830_v1 }
  0x62   :  { %652 = vmatpush3.msra.mxu1 %v334_v3 }
  0x63   :  { %653 = vmatprep.subr.mxu1 %v830_v1 }
  0x64   :  { %654 = vmatpush3.msra.mxu1 %v333_v4 }
  0xc2   :  { %v219_v18 = vpop.xlane.xlu0 %218 }
  0xc3   :  { %v220_v19 = vadd.f32 %v219_v18, %v214_v17  ;;  %v435_v17 = vld [vmem:[#allocation10 + $0x40] sm:$0xff]  ;;  %v434_v18 = vld [vmem:[#allocation10 + $0x38] sm:$0xff] }
  0xc5   :  { %222 = vst.msk [vmem:[#allocation3] sm:$0x3] %vm92_vm0, %v220_v19  ;;  %v433_v19 = vld [vmem:[#allocation10 + $0x30] sm:$0xff] }
  0xcc   :  { %v226_v20 = vld [vmem:[#allocation3] sm:$0x3] }
  0xcd   :  { %v227_v21 = vmax.f32 %v226_v20, 1e-09  ;;  %v432_v20 = vld [vmem:[#allocation10 + $0x28] sm:$0xff] }
  0xcf   :  { %706 = vrcp.f32 %v227_v21  ;;  %v431_v21 = vld [vmem:[#allocation10 + $0x20] sm:$0xff] }
  0xdc   :  { %v707_v22 = vpop.eup %706 }
  0xdd   :  { %232 = vperm.xlu0 %705, %v707_v22   ;;  %v430_v22 = vld [vmem:[#allocation10 + $0x18] sm:$0xff] }
  0xfc   :  { %v147_v23 = vpop.f32.mrf.mxu1 }
  0xfe   :  { %v596_v24 = vpop.f32.mrf.mxu1 }
  0xff   :  { %v428_v24 = vld [vmem:[#allocation10 + $0x8] sm:$0xff] }
 0x100   :  { %v150_v25 = vpop.f32.mrf.mxu1 }
 0x101   :  { %v427_v25 = vld [vmem:[#allocation10] sm:$0xff] }
 0x102   :  { %v597_v26 = vpop.f32.mrf.mxu1 }
 0x103   :  { %v543_v26 = vld [vmem:[%s979_s5] ss:$0 sm:$0xff] }
 0x104   :  { %v198_v27 = vpop.f32.mrf.mxu1 }
 0x105   :  { %v207_v28 = vrot.slane %v198_v27, 7 }
 0x106   :  { %v602_v30 = vpop.f32.mrf.mxu1 }
 0x107   :  { %v209_v31 = vsel %vm208_vm6, %v207_v28, %v147_v23  ;;  %v429_v23 = vld [vmem:[#allocation10 + $0x10] sm:$0xff] }
 0x108   :  { %v201_v32 = vpop.f32.mrf.mxu1  ;;  %v211_v33 = vadd.f32 %v209_v31, %v204_v29  ;;  %v544_v31 = vld [vmem:[%s981_s7] ss:$0 sm:$0xff] }
 0x10a   :  { %v603_v34 = vpop.f32.mrf.mxu1  ;;  %213 = vst.msk [vmem:[#allocation2] sm:$0x3] %vm90_vm5, %v211_v33 }
 0x111   :  { %v229_v36 = vld [vmem:[#allocation2] sm:$0x3] }
 0x158   :  { %v233_v35 = vpop.permute.xlu0 %232 }
 0x159   :  { %v235_v37 = vmul.f32 %v233_v35, %v229_v36 }
 0x15b   :  { %v236_v38 = vmul.f32 %v235_v37, %v235_v37 }
 0x15d   :  { %v237_v39 = vsel %vm90_vm5, %v236_v38, 0.0 }
 0x15e   :  { %238 = vadd.xlane.f32.xlu1 %v237_v39 }
 0x1e7   :  { %v239_v55 = vpop.xlane.xlu1 %238 }
 0x1e8   :  { %v240_v56 = vmax.f32 %v239_v55, 1e-24 }
 0x1ea   :  { %708 = vrsqrt.f32 %v240_v56 }
 0x1f7   :  { %v709_v57 = vpop.eup %708 }
 0x1f8   :  { %v242_v58 = vmul.f32 %v709_v57, %v235_v37 }
 0x1fa   :  { %621 = vmatmul.mubr.msk.f32.vlgmr.msra.gmra.mxu0 %vm258_vm7, %v242_v58 }
 0x1fb   :  { %690 = vmatprep.mubr.msk.f32.mxu0 %vm831_vm1, %v830_v1  ;;  %659 = vmatpush3.msra.mxu0 %v442_v5 }
 0x1fc   :  { %660 = vmatprep.subr.mxu0 %v830_v1 }
 0x1fd   :  { %661 = vmatpush3.msra.mxu0 %v441_v6 }
 0x1fe   :  { %662 = vmatprep.subr.mxu0 %v830_v1 }
 0x1ff   :  { %663 = vmatpush3.msra.mxu0 %v440_v7 }
 0x200   :  { %664 = vmatprep.subr.mxu0 %v830_v1 }
 0x201   :  { %665 = vmatpush3.msra.mxu0 %v439_v8 }
 0x202   :  { %666 = vmatprep.subr.mxu0 %v830_v1 }
 0x203   :  { %667 = vmatpush3.msra.mxu0 %v438_v9 }
 0x204   :  { %668 = vmatprep.subr.mxu0 %v830_v1 }
 0x205   :  { %669 = vmatpush3.msra.mxu0 %v437_v10 }
 0x206   :  { %670 = vmatprep.subr.mxu0 %v830_v1 }
 0x207   :  { %671 = vmatpush3.msra.mxu0 %v436_v11 }
 0x208   :  { %672 = vmatprep.subr.mxu0 %v830_v1 }
 0x209   :  { %673 = vmatpush3.msra.mxu0 %v435_v17 }
 0x20a   :  { %674 = vmatprep.subr.mxu0 %v830_v1 }
 0x20b   :  { %675 = vmatpush3.msra.mxu0 %v434_v18 }
 0x20c   :  { %676 = vmatprep.subr.mxu0 %v830_v1 }
 0x20d   :  { %677 = vmatpush3.msra.mxu0 %v433_v19 }
 0x20e   :  { %678 = vmatprep.subr.mxu0 %v830_v1 }
 0x20f   :  { %679 = vmatpush3.msra.mxu0 %v432_v20 }
 0x210   :  { %680 = vmatprep.subr.mxu0 %v830_v1 }
 0x211   :  { %681 = vmatpush3.msra.mxu0 %v431_v21 }
 0x212   :  { %682 = vmatprep.subr.mxu0 %v830_v1 }
 0x213   :  { %683 = vmatpush3.msra.mxu0 %v430_v22 }
 0x214   :  { %684 = vmatprep.subr.mxu0 %v830_v1 }
 0x215   :  { %685 = vmatpush3.msra.mxu0 %v429_v23 }
 0x216   :  { %686 = vmatprep.subr.mxu0 %v830_v1 }
 0x217   :  { %687 = vmatpush3.msra.mxu0 %v428_v24 }
 0x218   :  { %688 = vmatprep.subr.mxu0 %v830_v1 }
 0x219   :  { %689 = vmatpush3.msra.mxu0 %v427_v25 }
 0x2ba   :  { %v328_v13 = vpop.f32.mrf.mxu0 }
 0x2bb   :  { %v329_v14 = vadd.f32 %v541_v12, %v328_v13 }
 0x2bc   :  { %v622_v15 = vpop.f32.mrf.mxu0 }
 0x2bd   :  { %710 = vtanh.f32 %v329_v14 }
 0x2ca   :  { %v711_v16 = vpop.eup %710 }
 0x2cb   :  { %656 = vmatmul.mubr.f32.vlgmr.msra.gmra.mxu1 %v711_v16 }
 0x38b   :  { %v422_v27 = vpop.f32.mrf.mxu1 }
 0x38c   :  { %v423_v28 = vadd.f32 %v543_v26, %v422_v27 }
 0x38d   :  { %v657_v29 = vpop.f32.mrf.mxu1 }
 0x38e   :  { %712 = vtanh.f32 %v423_v28 }
 0x39b   :  { %v713_v30 = vpop.eup %712 }
 0x39c   :  { %691 = vmatmul.mubr.f32.vlgmr.msra.gmra.mxu0 %v713_v30 }
 0x45c   :  { %v516_v32 = vpop.f32.mrf.mxu0 }
 0x45d   :  { %v517_v33 = vadd.f32 %v544_v31, %v516_v32 }
 0x45e   :  { %v692_v1 = vpop.f32.mrf.mxu0 }
 0x45f   :  { %520 = vst [vmem:[#allocation12] sm:$0x3] %v517_v33 }
 0x460   :  { %805 = shalt.err (!%p802_p10)
}
 0x461   :  { %530 = dma.vmem_to_hbm [thread:$0]  %s528_s10, 32, %s982_s8, [#allocation6]  }
 0x462   :  { %820 = dma.done.wait [#allocation6], 32  }
 0x463   :  { %821 = vsyncadd [#allocation6], 4294967264 }
 0x464   :  { %534 = vsyncpa [#allocation5], 1 }
 0x465   :  { %535 = vsyncpa [#allocation8], 1 }
 0x466   :  { %536 = vsyncpa [#allocation11], 1 }
 0x467   :  { %537 = vsyncpa [#allocation6], 1 }

</bundles_post_ra>
